<compile_context>
chip_gen: v7x
topology: tpu7x:2x2x1
jax: 0.10.0
libtpu: 0.0.40
codegen_flags: <defaults>
</compile_context>

<pallas_src>
import numpy as np
import jax
import jax.numpy as jnp
from jax.experimental import pallas as pl
from jax.experimental.pallas import tpu as pltpu

_LANE = 128


# --------------------------------------------------------------------------- #
# Kernels
# --------------------------------------------------------------------------- #
def _make_sublane_kernel(n_seg, seg):
    """Softmax over each `seg`-sized segment of the sublane (middle) axis of a
    (block_pre, n_seg*seg, block_post) block."""
    def kernel(x_ref, o_ref):
        for j in range(n_seg):                       # static, tiny unroll
            x = x_ref[:, pl.ds(j * seg, seg), :]     # (bp, seg, bpost)
            m = jnp.max(x, axis=1, keepdims=True)    # exact in any dtype
            e = jnp.exp((x - m).astype(jnp.float32))  # exp/sum accumulate in f32
            s = jnp.sum(e, axis=1, keepdims=True)
            r = pl.reciprocal(s, approx=True)        # EUP (free slot)
            r = r * (2.0 - s * r)                    # one Newton step -> ~exact
            o_ref[:, pl.ds(j * seg, seg), :] = (e * r).astype(o_ref.dtype)
    return kernel


def _make_lane_kernel(n_seg, seg):
    """Softmax over each `seg`-sized lane segment of a (block_rows, n_seg*seg)
    block (n_seg > 1 == small-feat rows packed lane-dense)."""
    def kernel(x_ref, o_ref):
        for j in range(n_seg):
            x = x_ref[:, pl.ds(j * seg, seg)]        # (br, seg)
            m = jnp.max(x, axis=-1, keepdims=True)
            e = jnp.exp((x - m).astype(jnp.float32))
            s = jnp.sum(e, axis=-1, keepdims=True)
            r = pl.reciprocal(s, approx=True)
            r = r * (2.0 - s * r)
            o_ref[:, pl.ds(j * seg, seg)] = (e * r).astype(o_ref.dtype)
    return kernel


# --------------------------------------------------------------------------- #
# Hardware / sizing helpers
# --------------------------------------------------------------------------- #
def _vmem_capacity_bytes():
    try:
        info = pltpu.get_tpu_info()
        cap = getattr(info, "vmem_capacity_bytes", None)
        if cap:
            return int(cap)
    except Exception:
        pass
    return 64 * 1024 * 1024  # conservative (v7x per-TC VMEM)


def _num_tensorcores():
    """Best-effort TensorCore-per-chip count (v7x = 2, v5e/v6e = 1)."""
    try:
        info = pltpu.get_tpu_info()
    except Exception:
        return 1
    for attr in ("num_tensorcores", "tensorcore_count", "num_cores",
                 "cores_per_chip"):
        v = getattr(info, attr, None)
        if isinstance(v, (int, np.integer)) and 0 < int(v) <= 8:
            return int(v)
    # v7x (2 TCs/chip) is the only generation with 64 MiB VMEM per TensorCore.
    cap = getattr(info, "vmem_capacity_bytes", 0) or 0
    return 2 if 0 < cap <= 64 * 1024 * 1024 else 1


def _tile_budget_elems(cap_bytes):
    """Per-tile element budget: ~8 MiB working tile on 128 MiB parts (cap//16)
    and ~8 MiB on 64 MiB v7x parts (cap//8) — generation aware."""
    divisor = 16 if cap_bytes > 96 * 1024 * 1024 else 8
    return max(64 * 1024, (cap_bytes // divisor) // 4)


def _vmem_limit_bytes(block_elems, itemsize, cap_bytes):
    """Scoped-VMEM request derived from the chosen tile: double-buffered in +
    out blocks plus ~2 f32-block intermediates, +20% headroom."""
    need = block_elems * (4 * itemsize + 8)
    limit = int(need * 1.2)
    limit = max(limit, 32 * 1024 * 1024)
    return int(min(limit, int(cap_bytes * 0.85)))


def _sublane_pack(dtype):
    itemsize = jnp.dtype(dtype).itemsize
    if itemsize >= 4:
        return 8            # f32/i32 (8-byte types are not packed further)
    return {2: 16, 1: 32}[itemsize]


# --------------------------------------------------------------------------- #
# Wrappers
# --------------------------------------------------------------------------- #
def _softmax_inner_dim(x, dim, n_tc, budget_elems, cap_bytes):
    """Softmax over a non-trailing dim: reshape (no transpose) to
    (pre, g*C, post); reduce over sublane segments, `post` stays lane-dense."""
    shape = x.shape
    dtype = x.dtype
    itemsize = jnp.dtype(dtype).itemsize
    pre = int(np.prod(shape[:dim])) if dim > 0 else 1
    C = int(shape[dim])
    post = int(np.prod(shape[dim + 1:]))

    # Small-C sublane fold: fill the 8/16/32 sublane pack with g groups of C.
    pack = _sublane_pack(dtype)
    n_seg = 1
    if 0 < C < pack and pack % C == 0 and pre % (pack // C) == 0:
        n_seg = pack // C
        pre //= n_seg
    mid = n_seg * C

    if mid * min(post, _LANE) > budget_elems:
        # Reduction fibre alone exceeds a VMEM tile.
        # TODO(synk): online softmax (feature-tiled "arbitrary" axis + scratch).
        return jax.nn.softmax(x, axis=dim)

    x3 = x.reshape(pre, mid, post)            # contiguous reshape: no HBM copy

    # Lane block: the full dim if it fits, else a multiple of 128 (ragged edge
    # is masked by Pallas; columns are independent, so garbage lanes are safe).
    lane_cap = max(_LANE, budget_elems // mid)
    if post <= lane_cap:
        block_post = post
    else:
        block_post = max(_LANE, min((lane_cap // _LANE) * _LANE,
                                    (post // _LANE) * _LANE))

    pre_cap = max(1, budget_elems // (mid * block_post))
    block_pre = min(pre, pre_cap)

    # Megacore: only force >=2 grid steps on 2-TensorCore chips (v7x).
    if n_tc >= 2 and pl.cdiv(pre, block_pre) * pl.cdiv(post, block_post) < 2:
        if block_pre > 1:
            block_pre = (block_pre + 1) // 2
        elif block_post > _LANE:
            block_post = max(_LANE, ((block_post // 2) // _LANE) * _LANE)

    grid = (pl.cdiv(pre, block_pre), pl.cdiv(post, block_post))
    block_elems = block_pre * mid * block_post

    out3 = pl.pallas_call(
        _make_sublane_kernel(n_seg, C),
        out_shape=jax.ShapeDtypeStruct((pre, mid, post), dtype),
        grid_spec=pltpu.PrefetchScalarGridSpec(
            num_scalar_prefetch=0,
            grid=grid,
            # TODO(synk): consider pipeline_mode=pl.Buffered(3) on v7x if
            # profiling shows exposed DMA after the larger tiles.
            in_specs=[pl.BlockSpec((block_pre, mid, block_post),
                                   lambda i, j: (i, 0, j))],
            out_specs=pl.BlockSpec((block_pre, mid, block_post),
                                   lambda i, j: (i, 0, j)),
        ),
        compiler_params=pltpu.CompilerParams(
            dimension_semantics=("parallel", "parallel"),
            vmem_limit_bytes=_vmem_limit_bytes(block_elems, itemsize, cap_bytes),
        ),
    )(x3)
    return out3.reshape(shape)


def _softmax_last_dim(x, n_tc, budget_elems, cap_bytes):
    """Softmax over the trailing dim: (rows, feat), reduce over lanes.  Small
    feat is packed g-per-128-lane-row so HBM stores are lane-dense."""
    shape = x.shape
    dtype = x.dtype
    itemsize = jnp.dtype(dtype).itemsize
    feat = int(shape[-1])
    rows = int(np.prod(shape[:-1])) if x.ndim > 1 else 1
    pack = _sublane_pack(dtype)

    # Lane-dense packing for small feat (free contiguous reshape).
    n_seg, seg = 1, feat
    if 0 < feat < _LANE and _LANE % feat == 0 and rows % (_LANE // feat) == 0:
        n_seg = _LANE // feat
        seg = feat
        rows //= n_seg
        feat = _LANE

    if feat * pack > budget_elems:
        # A single row-block of the reduction dim does not fit in VMEM.
        # TODO(synk): online softmax (feature-tiled "arbitrary" axis + m/l
        # scratch and a normalize pass) for huge trailing dims.
        return jax.nn.softmax(x, axis=-1)

    x2 = x.reshape(rows, feat)

    # Row block sized purely from the VMEM budget (no arbitrary 512 cap),
    # aligned to the dtype sublane pack; ragged last block is masked.
    cap_rows = max(pack, budget_elems // feat)
    block_rows = rows if cap_rows >= rows else max(pack,
                                                   (cap_rows // pack) * pack)

    # Megacore: only split on 2-TensorCore chips, and only if legal.
    if n_tc >= 2 and pl.cdiv(rows, block_rows) < 2 and block_rows >= 2 * pack:
        half = (rows + 1) // 2
        block_rows = max(pack, ((half + pack - 1) // pack) * pack)

    grid = (pl.cdiv(rows, block_rows),)
    block_elems = block_rows * feat

    out2 = pl.pallas_call(
        _make_lane_kernel(n_seg, seg),
        out_shape=jax.ShapeDtypeStruct((rows, feat), dtype),
        grid_spec=pltpu.PrefetchScalarGridSpec(
            num_scalar_prefetch=0,
            grid=grid,
            in_specs=[pl.BlockSpec((block_rows, feat), lambda i: (i, 0))],
            out_specs=pl.BlockSpec((block_rows, feat), lambda i: (i, 0)),
        ),
        compiler_params=pltpu.CompilerParams(
            dimension_semantics=("parallel",),
            vmem_limit_bytes=_vmem_limit_bytes(block_elems, itemsize, cap_bytes),
        ),
    )(x2)
    return out2.reshape(shape)


def stable_softmax(x, dim=-1):
    """Numerically stable softmax over `dim` (StableSoftmax.forward).
    Note: the PyTorch module's dim=None default is not usable with torch.max
    either; an explicit dim (default -1 here) is expected."""
    ndim = x.ndim
    d = dim % ndim
    cap_bytes = _vmem_capacity_bytes()
    budget = _tile_budget_elems(cap_bytes)
    n_tc = _num_tensorcores()
    if d == ndim - 1:
        return _softmax_last_dim(x, n_tc, budget, cap_bytes)
    return _softmax_inner_dim(x, d, n_tc, budget, cap_bytes)


if __name__ == "__main__":
    key = jax.random.PRNGKey(0)
    # NCHW channel softmax, matching StableSoftmax(dim=1).
    x = jax.random.normal(key, (2, 4, 16, 16), dtype=jnp.float32)
    out = jax.block_until_ready(stable_softmax(x, dim=1))
    ref = jax.nn.softmax(x, axis=1)
    np.testing.assert_allclose(np.asarray(out), np.asarray(ref),
                               rtol=1e-4, atol=1e-6)
    assert out.shape == x.shape and out.dtype == x.dtype

    # Trailing-dim path (small feat -> lane-dense packed path).
    x2 = jax.random.normal(jax.random.PRNGKey(1), (2, 8, 32), dtype=jnp.float32)
    out2 = jax.block_until_ready(stable_softmax(x2, dim=-1))
    np.testing.assert_allclose(np.asarray(out2),
                               np.asarray(jax.nn.softmax(x2, axis=-1)),
                               rtol=1e-4, atol=1e-6)

    print("KERNEL_OK")
</pallas_src>

<mosaic_0001>
module attributes {stable_mosaic.version = 11 : i64} {
  func.func @kernel(%arg0: i32, %arg1: i32, %arg2: memref<1x8x256xf32, #tpu.memory_space<vmem>>, %arg3: memref<1x8x256xf32, #tpu.memory_space<vmem>>) attributes {dimension_semantics = [#tpu.dimension_semantics<parallel>, #tpu.dimension_semantics<parallel>], iteration_bounds = array<i64: 1, 1>, scalar_prefetch = 0 : i64, scratch_operands = 0 : i64, tpu.core_type = #tpu.core_type<tc>, window_params = [{transform_indices = @transform_0, window_bounds = array<i64: 1, 8, 256>}, {transform_indices = @transform_1, window_bounds = array<i64: 1, 8, 256>}]} {
    %c0 = arith.constant 0 : index
    %c0_0 = arith.constant 0 : index
    %c0_1 = arith.constant 0 : index
    %0 = vector.load %arg2[%c0, %c0_0, %c0_1] : memref<1x8x256xf32, #tpu.memory_space<vmem>>, vector<1x4x256xf32>
    %cst = arith.constant dense<0xFF800000> : vector<1x256xf32>
    %1 = vector.multi_reduction <maximumf>, %0, %cst [1] : vector<1x4x256xf32> to vector<1x256xf32>
    %2 = vector.shape_cast %1 : vector<1x256xf32> to vector<1x1x256xf32>
    %3 = vector.broadcast %2 : vector<1x1x256xf32> to vector<1x4x256xf32>
    %4 = arith.subf %0, %3 : vector<1x4x256xf32>
    %5 = math.exp %4 : vector<1x4x256xf32>
    %cst_2 = arith.constant dense<0.000000e+00> : vector<1x256xf32>
    %6 = vector.multi_reduction <add>, %5, %cst_2 [1] : vector<1x4x256xf32> to vector<1x256xf32>
    %7 = vector.shape_cast %6 : vector<1x256xf32> to vector<1x1x256xf32>
    %8 = tpu.reciprocal %7 {approx = true} : vector<1x1x256xf32> -> vector<1x1x256xf32>
    %9 = arith.mulf %7, %8 : vector<1x1x256xf32>
    %cst_3 = arith.constant 2.000000e+00 : f32
    %10 = vector.broadcast %cst_3 : f32 to vector<1x1x256xf32>
    %11 = arith.subf %10, %9 : vector<1x1x256xf32>
    %12 = arith.mulf %8, %11 : vector<1x1x256xf32>
    %13 = vector.broadcast %12 : vector<1x1x256xf32> to vector<1x4x256xf32>
    %14 = arith.mulf %5, %13 : vector<1x4x256xf32>
    %c0_4 = arith.constant 0 : index
    %c0_5 = arith.constant 0 : index
    %c0_6 = arith.constant 0 : index
    %15 = vector.load %arg3[%c0_4, %c0_5, %c0_6] : memref<1x8x256xf32, #tpu.memory_space<vmem>>, vector<1x4x256xf32>
    tpu.vector_store %arg3[%c0_4, %c0_5, %c0_6], %14 {strides = array<i32>} : memref<1x8x256xf32, #tpu.memory_space<vmem>>, vector<1x4x256xf32>,
    %c0_7 = arith.constant 0 : index
    %c4 = arith.constant 4 : index
    %c0_8 = arith.constant 0 : index
    %16 = vector.load %arg2[%c0_7, %c4, %c0_8] : memref<1x8x256xf32, #tpu.memory_space<vmem>>, vector<1x4x256xf32>
    %cst_9 = arith.constant dense<0xFF800000> : vector<1x256xf32>
    %17 = vector.multi_reduction <maximumf>, %16, %cst_9 [1] : vector<1x4x256xf32> to vector<1x256xf32>
    %18 = vector.shape_cast %17 : vector<1x256xf32> to vector<1x1x256xf32>
    %19 = vector.broadcast %18 : vector<1x1x256xf32> to vector<1x4x256xf32>
    %20 = arith.subf %16, %19 : vector<1x4x256xf32>
    %21 = math.exp %20 : vector<1x4x256xf32>
    %cst_10 = arith.constant dense<0.000000e+00> : vector<1x256xf32>
    %22 = vector.multi_reduction <add>, %21, %cst_10 [1] : vector<1x4x256xf32> to vector<1x256xf32>
    %23 = vector.shape_cast %22 : vector<1x256xf32> to vector<1x1x256xf32>
    %24 = tpu.reciprocal %23 {approx = true} : vector<1x1x256xf32> -> vector<1x1x256xf32>
    %25 = arith.mulf %23, %24 : vector<1x1x256xf32>
    %cst_11 = arith.constant 2.000000e+00 : f32
    %26 = vector.broadcast %cst_11 : f32 to vector<1x1x256xf32>
    %27 = arith.subf %26, %25 : vector<1x1x256xf32>
    %28 = arith.mulf %24, %27 : vector<1x1x256xf32>
    %29 = vector.broadcast %28 : vector<1x1x256xf32> to vector<1x4x256xf32>
    %30 = arith.mulf %21, %29 : vector<1x4x256xf32>
    %c0_12 = arith.constant 0 : index
    %c4_13 = arith.constant 4 : index
    %c0_14 = arith.constant 0 : index
    %31 = vector.load %arg3[%c0_12, %c4_13, %c0_14] : memref<1x8x256xf32, #tpu.memory_space<vmem>>, vector<1x4x256xf32>
    tpu.vector_store %arg3[%c0_12, %c4_13, %c0_14], %30 {strides = array<i32>} : memref<1x8x256xf32, #tpu.memory_space<vmem>>, vector<1x4x256xf32>,
    return
  }
  func.func @transform_0(%arg0: i32, %arg1: i32) -> (i32, i32, i32) {
    %c0_i32 = arith.constant 0 : i32
    %c0_i32_0 = arith.constant 0 : i32
    return %arg0, %c0_i32, %arg1 : i32, i32, i32
  }
  func.func @transform_1(%arg0: i32, %arg1: i32) -> (i32, i32, i32) {
    %c0_i32 = arith.constant 0 : i32
    %c0_i32_0 = arith.constant 0 : i32
    return %arg0, %c0_i32, %arg1 : i32, i32, i32
  }
}

</mosaic_0001>

<bundles_post_ra>
// kernel: tpu_custom_call.1
= control target key start
LH: loop header
LB: loop body
LE: loop exit
PB: predicated region body
PF: predicated region fallthrough
CT: control target
= control target key end

     0   :  { %6 = vsyncpa [#allocation3], 0  ;;  %s248_s0 = inlined_call_operand.hbm [shape: f32[1,8,256], index: 0, kind: input, shape index: {}]   ;;  %s249_s1 = inlined_call_operand.hbm [shape: f32[1,8,256], index: 1, kind: output, shape index: {}]  }
   0x1   :  { %7 = vsyncpa [#allocation4], 0  ;;  %s206_s6 = smov [#allocation2]   ;;  %s158_s10 = scalar_lea.hbm %s248_s0, 256 }
   0x2   :  { %s14_s7 = sshll.u32 %s206_s6, 4  ;;  %p159_p0 = scmp.ne.s32.totalorder %s248_s0, %s158_s10  ;;  %s15_s7 = int_to_ptr.vmem [resolvable:$true] %s14_s7 }
   0x3   :  { %p162_p1 = scmp.lt.u32.totalorder %s158_s10, %s248_s0 }
   0x5   :  { %p164_p2 = pnand %p162_p1, %p159_p0 }
   0x7   :  { %167 = shalt.err (!%p164_p2)
}
   0x8   :  { %s168_s15 = scalar_lea.vmem %s15_s7, 256  ;;  %p173_p4 = scmp.lt.s32.totalorder %s15_s7, %s15_s7 }
   0x9   :  { %p169_p3 = scmp.ne.s32.totalorder %s15_s7, %s168_s15  ;;  %p174_p5 = scmp.lt.s32.totalorder %s168_s15, %s168_s15 }
   0xb   :  { %p175_p6 = por %p174_p5, %p173_p4 }
   0xd   :  { %p176_p7 = pnand %p175_p6, %p169_p3 }
   0xf   :  { %179 = shalt.err (!%p176_p7)
}
  0x10   :  { %17 = dma.hbm_to_vmem [thread:$0]  %s248_s0, 256, %s15_s7, [#allocation3]  }
  0x11   :  { %202 = dma.done.wait [#allocation3], 256  }
  0x12   :  { %203 = vsyncadd [#allocation3], 4294967040  ;;  %vm23_vm0 = vcmask 1043456   ;;  %vm72_vm1 = vcmask 1047556   ;;  %v21_v0 = vld [vmem:[#allocation2] sm:$0xf] }
  0x13   :  { %v22_v1 = vld [vmem:[#allocation2 + $0x8] sm:$0xf]  ;;  %v70_v2 = vld [vmem:[#allocation2] sm:$0xf0]  ;;  %v24_v3 = vsel %vm23_vm0, %v21_v0, -inf  ;;  %s207_s0 = smov [#allocation5]  }
  0x14   :  { %v31_v4 = vsel %vm23_vm0, %v22_v1, -inf  ;;  %v73_v5 = vsel %vm72_vm1, %v70_v2, -inf  ;;  %v71_v6 = vld [vmem:[#allocation2 + $0x8] sm:$0xf0]  ;;  %v25_v7 = vrot.slane %v24_v3, 4  ;;  %s131_s18 = sshll.u32 %s207_s0, 4  ;;  %s132_s18 = int_to_ptr.vmem [resolvable:$true] %s131_s18 }
  0x15   :  { %v32_v8 = vrot.slane %v31_v4, 4  ;;  %v74_v9 = vrot.slane %v73_v5, 4  ;;  %v80_v10 = vsel %vm72_vm1, %v71_v6, -inf  ;;  %s180_s19 = scalar_lea.vmem %s132_s18, 256  ;;  %p185_p9 = scmp.lt.s32.totalorder %s132_s18, %s132_s18 }
  0x16   :  { %v81_v11 = vrot.slane %v80_v10, 4  ;;  %v26_v12 = vmax.f32 %v24_v3, %v25_v7  ;;  %p181_p8 = scmp.ne.s32.totalorder %s132_s18, %s180_s19  ;;  %p186_p10 = scmp.lt.s32.totalorder %s180_s19, %s180_s19 }
  0x17   :  { %v33_v13 = vmax.f32 %v31_v4, %v32_v8  ;;  %v75_v14 = vmax.f32 %v73_v5, %v74_v9 }
  0x18   :  { %v82_v15 = vmax.f32 %v80_v10, %v81_v11  ;;  %v27_v16 = vrot.slane %v26_v12, 2  ;;  %p187_p11 = por %p186_p10, %p185_p9 }
  0x19   :  { %v34_v17 = vrot.slane %v33_v13, 2  ;;  %v76_v18 = vrot.slane %v75_v14, 2 }
  0x1a   :  { %v83_v19 = vrot.slane %v82_v15, 2  ;;  %v28_v20 = vmax.f32 %v26_v12, %v27_v16  ;;  %p188_p12 = pnand %p187_p11, %p181_p8 }
  0x1b   :  { %v35_v21 = vmax.f32 %v33_v13, %v34_v17  ;;  %v77_v22 = vmax.f32 %v75_v14, %v76_v18 }
  0x1c   :  { %v84_v23 = vmax.f32 %v82_v15, %v83_v19  ;;  %v29_v24 = vrot.slane %v28_v20, 1 }
  0x1d   :  { %v36_v25 = vrot.slane %v35_v21, 1  ;;  %v78_v26 = vrot.slane %v77_v22, 1 }
  0x1e   :  { %v85_v27 = vrot.slane %v84_v23, 1  ;;  %v30_v28 = vmax.f32 %v28_v20, %v29_v24 }
  0x1f   :  { %v37_v29 = vmax.f32 %v35_v21, %v36_v25  ;;  %v79_v30 = vmax.f32 %v77_v22, %v78_v26 }
  0x20   :  { %v86_v31 = vmax.f32 %v84_v23, %v85_v27  ;;  %v38_v32 = vsub.f32 %v21_v0, %v30_v28 }
  0x21   :  { %v39_v33 = vsub.f32 %v22_v1, %v37_v29  ;;  %v87_v34 = vsub.f32 %v70_v2, %v79_v30 }
  0x22   :  { %v88_v35 = vsub.f32 %v71_v6, %v86_v31  ;;  %v40_v36 = vmul.f32 1.442695, %v38_v32 }
  0x23   :  { %v42_v37 = vmul.f32 1.442695, %v39_v33  ;;  %v89_v38 = vmul.f32 1.442695, %v87_v34 }
  0x24   :  { %v91_v39 = vmul.f32 1.442695, %v88_v35  ;;  %142 = vpow2.f32 %v40_v36 }
  0x25   :  { %144 = vpow2.f32 %v42_v37 }
  0x26   :  { %146 = vpow2.f32 %v89_v38 }
  0x27   :  { %148 = vpow2.f32 %v91_v39 }
  0x2e   :  { %v143_v40 = vpop.eup %142 }
  0x2f   :  { %v145_v41 = vpop.eup %144  ;;  %v44_v42 = vsel %vm23_vm0, %v143_v40, 0.0 }
  0x30   :  { %v147_v43 = vpop.eup %146  ;;  %v45_v44 = vrot.slane %v44_v42, 4  ;;  %v51_v45 = vsel %vm23_vm0, %v145_v41, 0.0 }
  0x31   :  { %v149_v46 = vpop.eup %148  ;;  %v52_v47 = vrot.slane %v51_v45, 4  ;;  %v95_v48 = vrot.slane %v147_v43, 4 }
  0x32   :  { %v46_v49 = vadd.f32 %v45_v44, %v44_v42  ;;  %v96_v50 = vrot.slane %v149_v46, 4 }
  0x33   :  { %v53_v51 = vadd.f32 %v52_v47, %v51_v45  ;;  %v99_v52 = vsel %vm23_vm0, %v95_v48, 0.0 }
  0x34   :  { %v47_v53 = vrot.slane %v46_v49, 2  ;;  %v100_v54 = vrot.slane %v99_v52, 4  ;;  %v106_v55 = vsel %vm23_vm0, %v96_v50, 0.0 }
  0x35   :  { %v54_v56 = vrot.slane %v53_v51, 2  ;;  %v107_v57 = vrot.slane %v106_v55, 4 }
  0x36   :  { %v48_v58 = vadd.f32 %v47_v53, %v46_v49  ;;  %v101_v59 = vadd.f32 %v100_v54, %v99_v52 }
  0x37   :  { %v55_v60 = vadd.f32 %v54_v56, %v53_v51  ;;  %v108_v61 = vadd.f32 %v107_v57, %v106_v55 }
  0x38   :  { %v49_v62 = vrot.slane %v48_v58, 1  ;;  %v102_v63 = vrot.slane %v101_v59, 2 }
  0x39   :  { %v56_v0 = vrot.slane %v55_v60, 1  ;;  %v109_v1 = vrot.slane %v108_v61, 2 }
  0x3a   :  { %v50_v2 = vadd.f32 %v49_v62, %v48_v58  ;;  %v103_v3 = vadd.f32 %v102_v63, %v101_v59 }
  0x3b   :  { %v57_v4 = vadd.f32 %v56_v0, %v55_v60  ;;  %v110_v5 = vadd.f32 %v109_v1, %v108_v61 }
  0x3c   :  { %150 = vrcp.f32 %v50_v2  ;;  %v104_v6 = vrot.slane %v103_v3, 1 }
  0x3d   :  { %152 = vrcp.f32 %v57_v4  ;;  %v111_v7 = vrot.slane %v110_v5, 1 }
  0x3e   :  { %v105_v8 = vadd.f32 %v104_v6, %v103_v3 }
  0x3f   :  { %v112_v9 = vadd.f32 %v111_v7, %v110_v5 }
  0x40   :  { %154 = vrcp.f32 %v105_v8 }
  0x41   :  { %156 = vrcp.f32 %v112_v9 }
  0x46   :  { %v151_v10 = vpop.eup %150 }
  0x47   :  { %v153_v11 = vpop.eup %152  ;;  %v60_v12 = vmul.f32 %v151_v10, %v50_v2 }
  0x48   :  { %v61_v13 = vmul.f32 %v153_v11, %v57_v4 }
  0x49   :  { %v62_v14 = vsub.f32 2.0, %v60_v12 }
  0x4a   :  { %v155_v15 = vpop.eup %154  ;;  %v63_v16 = vsub.f32 2.0, %v61_v13 }
  0x4b   :  { %v157_v17 = vpop.eup %156  ;;  %v64_v18 = vmul.f32 %v151_v10, %v62_v14  ;;  %v115_v19 = vmul.f32 %v155_v15, %v105_v8 }
  0x4c   :  { %v65_v20 = vmul.f32 %v153_v11, %v63_v16  ;;  %v116_v21 = vmul.f32 %v157_v17, %v112_v9 }
  0x4d   :  { %v66_v22 = vmul.f32 %v143_v40, %v64_v18  ;;  %v117_v23 = vsub.f32 2.0, %v115_v19 }
  0x4e   :  { %v67_v24 = vmul.f32 %v145_v41, %v65_v20  ;;  %v118_v25 = vsub.f32 2.0, %v116_v21 }
  0x4f   :  { %68 = vst [vmem:[#allocation5] sm:$0xf] %v66_v22  ;;  %v119_v26 = vmul.f32 %v155_v15, %v117_v23 }
  0x50   :  { %69 = vst [vmem:[#allocation5 + $0x8] sm:$0xf] %v67_v24  ;;  %v120_v27 = vmul.f32 %v157_v17, %v118_v25 }
  0x51   :  { %v121_v28 = vmul.f32 %v147_v43, %v119_v26 }
  0x52   :  { %v122_v29 = vmul.f32 %v149_v46, %v120_v27 }
  0x53   :  { %123 = vst [vmem:[#allocation5] sm:$0xf0] %v121_v28 }
  0x54   :  { %124 = vst [vmem:[#allocation5 + $0x8] sm:$0xf0] %v122_v29 }
  0x55   :  { %191 = shalt.err (!%p188_p12)
}
  0x56   :  { %s192_s22 = scalar_lea.hbm %s249_s1, 256 }
  0x57   :  { %p193_p13 = scmp.ne.s32.totalorder %s249_s1, %s192_s22  ;;  %p196_p0 = scmp.lt.u32.totalorder %s192_s22, %s249_s1 }
  0x59   :  { %p198_p1 = pnand %p196_p0, %p193_p13 }
  0x5b   :  { %201 = shalt.err (!%p198_p1)
}
  0x5c   :  { %134 = dma.vmem_to_hbm [thread:$0]  %s132_s18, 256, %s249_s1, [#allocation4]  }
  0x5d   :  { %204 = dma.done.wait [#allocation4], 256  }
  0x5e   :  { %205 = vsyncadd [#allocation4], 4294967040 }
  0x5f   :  { %138 = vsyncpa [#allocation3], 1 }
  0x60   :  { %139 = vsyncpa [#allocation4], 1 }

</bundles_post_ra>
